<compile_context>
chip_gen: v7x
topology: tpu7x:2x2x1
jax: 0.10.0
libtpu: 0.0.40
codegen_flags: <defaults>
</compile_context>

<pallas_src>
import functools

import jax
import jax.numpy as jnp
from jax.experimental import pallas as pl
from jax.experimental.pallas import tpu as pltpu


def _ntxent_kernel(q_org_ref, q_aug_ref, kt_org_ref, kt_aug_ref, out_ref, *,
                   inv_temp: float):
    f32 = jnp.float32
    bf16 = jnp.bfloat16
    th = q_org_ref.shape[0]
    B = kt_org_ref.shape[1]

    qi = pl.program_id(0)
    base = qi * th  # first global row (within a half) handled by this step

    # Query tiles: rows of the wrapper-normalized embeddings (f32, exact).
    q_org = q_org_ref[...]                                   # (th, D) f32
    q_aug = q_aug_ref[...]                                   # (th, D) f32

    # Positive logit cos(z_org_j, z_aug_j) / temp — exact f32 row-wise dot,
    # identical for both halves (cosine is symmetric).
    pos = jnp.sum(q_org * q_aug, axis=-1, keepdims=True) * f32(inv_temp)

    # bf16 queries for the MXU (1/temp is already folded into the bf16 keys).
    q_org_b = q_org.astype(bf16)
    q_aug_b = q_aug.astype(bf16)

    # Resident pre-normalized, pre-scaled, pre-transposed keys in canonical
    # (K=D, N=B) layout: no in-kernel transpose, normalization or cast.
    kt_org = kt_org_ref[...]                                 # (D, B) bf16
    kt_aug = kt_aug_ref[...]                                 # (D, B) bf16

    # Self-similarity mask — identical for both halves: local query row j sits
    # at column base + j of its *own* half's similarity slab.
    lrow = jax.lax.broadcasted_iota(jnp.int32, (th, B), 0)
    col = jax.lax.broadcasted_iota(jnp.int32, (th, B), 1)
    diag = col == (lrow + base)
    neg_inf = f32(-1e30)

    def _row_loss(q_b, k_same, k_other):
        # bf16 MXU matmuls with f32 accumulation.
        s_same = jnp.dot(q_b, k_same, preferred_element_type=f32)    # (th, B)
        s_other = jnp.dot(q_b, k_other, preferred_element_type=f32)  # (th, B)
        s_same = jnp.where(diag, neg_inf, s_same)     # drop self-similarity
        # Row-wise logsumexp over all j != i (positive included, matching the
        # reference's logits = [negatives, positive]).
        m = jnp.maximum(jnp.max(s_same, axis=-1, keepdims=True),
                        jnp.max(s_other, axis=-1, keepdims=True))
        ssum = (jnp.sum(jnp.exp(s_same - m), axis=-1, keepdims=True)
                + jnp.sum(jnp.exp(s_other - m), axis=-1, keepdims=True))
        return m + jnp.log(ssum) - pos                                # (th, 1)

    l_org = _row_loss(q_org_b, kt_org, kt_aug)
    l_aug = _row_loss(q_aug_b, kt_aug, kt_org)

    # Reduce in-kernel: one per-tile partial sum, written lane-dense
    # (replicated across 128 lanes -> unmasked stores, tiny HBM writeback).
    partial = jnp.sum(l_org + l_aug, axis=0, keepdims=True)           # (1, 1)
    out_ref[...] = jnp.broadcast_to(partial, (1, 128)).astype(f32)


def _normalize(x: jax.Array) -> jax.Array:
    # torch.cosine_similarity clamps each norm at eps=1e-8; clamping the
    # squared norm at 1e-16 under rsqrt is equivalent.
    x = x.astype(jnp.float32)
    ss = jnp.sum(x * x, axis=-1, keepdims=True)
    return x * jax.lax.rsqrt(jnp.maximum(ss, jnp.float32(1e-16)))


def _pick_half_tile(batch_size: int) -> int:
    # v6e/v7x MXUs are 2x256x256: prefer th a multiple of 256 (512 first)
    # while keeping num_tiles >= 2 so the "parallel" row axis can split across
    # both v7x TensorCores.  Fall back to any divisor in {512, 256, 128}, then
    # to a single full-batch step (small problems, e.g. the demo).
    for cand in (512, 256):
        if batch_size % cand == 0 and batch_size // cand >= 2:
            return cand
    for cand in (512, 256, 128):
        if batch_size % cand == 0:
            return cand
    return batch_size


def _vmem_estimate(B: int, D: int, th: int) -> int:
    return (2 * D * B * 2            # resident bf16 keys (single-buffered)
            + 2 * 2 * th * D * 4     # double-buffered f32 query tiles
            + 8 * th * B * 4         # (th, B) f32 similarity/exp/mask slabs
            + (2 << 20))             # compiler scratch slack


def ntxent_loss(z_org: jax.Array, z_aug: jax.Array, temp: float) -> jax.Array:
    assert z_org.shape == z_aug.shape and z_org.ndim == 2
    B, D = z_org.shape
    n = 2 * B
    inv_temp = float(1.0 / temp)

    # Per-TensorCore VMEM budget; fall back to the smallest (v7x: 64 MiB).
    try:
        vmem_cap = int(pltpu.get_tpu_info().vmem_capacity_bytes)
    except Exception:
        vmem_cap = 64 << 20
    budget = vmem_cap - (8 << 20)

    th = _pick_half_tile(B)
    # Shrink the row tile (keeping it a multiple of 128) if the estimated
    # per-step live set exceeds the device budget (mostly a v7x concern).
    while th % 256 == 0 and _vmem_estimate(B, D, th) > budget:
        th //= 2
    num_tiles = B // th

    # Hoisted key preparation (once, in plain JAX): L2-normalize, fold 1/temp
    # into the keys, transpose to (K=D, N=B) MXU layout, cast to bf16.
    zn_org = _normalize(z_org)                                   # (B, D) f32
    zn_aug = _normalize(z_aug)                                   # (B, D) f32
    kt_org = (zn_org * jnp.float32(inv_temp)).T.astype(jnp.bfloat16)  # (D, B)
    kt_aug = (zn_aug * jnp.float32(inv_temp)).T.astype(jnp.bfloat16)  # (D, B)

    est = _vmem_estimate(B, D, th)
    compiler_kwargs = dict(dimension_semantics=("parallel",))
    if est > (16 << 20):
        # Raise the scoped-VMEM limit only when the default may be short, and
        # never above the device's physical capacity minus headroom.
        compiler_kwargs["vmem_limit_bytes"] = int(min(max(est, 32 << 20),
                                                      budget))

    kernel = functools.partial(_ntxent_kernel, inv_temp=inv_temp)

    partials = pl.pallas_call(
        kernel,
        out_shape=jax.ShapeDtypeStruct((1, num_tiles * 128), jnp.float32),
        grid_spec=pltpu.PrefetchScalarGridSpec(
            num_scalar_prefetch=0,
            grid=(num_tiles,),
            in_specs=[
                # Pipelined per-step query tiles (default double-buffering).
                pl.BlockSpec((th, D), lambda qi: (qi, 0)),
                pl.BlockSpec((th, D), lambda qi: (qi, 0)),
                # Grid-invariant resident keys: a second buffer is dead VMEM.
                pl.BlockSpec((D, B), lambda qi: (0, 0),
                             pipeline_mode=pl.Buffered(1)),
                pl.BlockSpec((D, B), lambda qi: (0, 0),
                             pipeline_mode=pl.Buffered(1)),
            ],
            out_specs=pl.BlockSpec((1, 128), lambda qi: (0, qi)),
        ),
        compiler_params=pltpu.CompilerParams(**compiler_kwargs),
    )(zn_org, zn_aug, kt_org, kt_aug)

    # Each 128-lane block holds one per-tile partial sum (replicated).
    tile_sums = partials.reshape(num_tiles, 128)[:, 0]
    # CrossEntropyLoss(reduction="mean") over all 2B rows.
    return jnp.sum(tile_sums) / jnp.float32(n)


if __name__ == "__main__":
    # Small, deterministic example consistent with the module's forward:
    # batch_size = 4, feature dim = 32, temp = 0.5.
    batch_size, feat_dim, temp = 4, 32, 0.5
    key = jax.random.PRNGKey(0)
    k1, k2 = jax.random.split(key)
    z_org = jax.random.normal(k1, (batch_size, feat_dim), dtype=jnp.float32)
    z_aug = jax.random.normal(k2, (batch_size, feat_dim), dtype=jnp.float32)

    loss = jax.jit(ntxent_loss, static_argnums=(2,))(z_org, z_aug, temp)
    jax.block_until_ready(loss)
    print("KERNEL_OK")
</pallas_src>

<mosaic_0001>
module attributes {stable_mosaic.version = 11 : i64} {
  func.func @_ntxent_kernel(%arg0: i32, %arg1: memref<4x32xf32, #tpu.memory_space<vmem>>, %arg2: memref<4x32xf32, #tpu.memory_space<vmem>>, %arg3: memref<32x4xbf16, #tpu.memory_space<vmem>>, %arg4: memref<32x4xbf16, #tpu.memory_space<vmem>>, %arg5: memref<1x128xf32, #tpu.memory_space<vmem>>) attributes {dimension_semantics = [#tpu.dimension_semantics<parallel>], iteration_bounds = array<i64: 1>, scalar_prefetch = 0 : i64, scratch_operands = 0 : i64, tpu.core_type = #tpu.core_type<tc>, window_params = [{transform_indices = @transform_0, window_bounds = array<i64: 4, 32>}, {transform_indices = @transform_1, window_bounds = array<i64: 4, 32>}, {pipeline_mode = #tpu.pipeline_mode<synchronous>, transform_indices = @transform_2, window_bounds = array<i64: 32, 4>}, {pipeline_mode = #tpu.pipeline_mode<synchronous>, transform_indices = @transform_3, window_bounds = array<i64: 32, 4>}, {transform_indices = @transform_4, window_bounds = array<i64: 1, 128>}]} {
    %c4_i32 = arith.constant 4 : i32
    %0 = arith.muli %arg0, %c4_i32 : i32
    %c0 = arith.constant 0 : index
    %c0_0 = arith.constant 0 : index
    %1 = vector.load %arg1[%c0, %c0_0] : memref<4x32xf32, #tpu.memory_space<vmem>>, vector<4x32xf32>
    %c0_1 = arith.constant 0 : index
    %c0_2 = arith.constant 0 : index
    %2 = vector.load %arg2[%c0_1, %c0_2] : memref<4x32xf32, #tpu.memory_space<vmem>>, vector<4x32xf32>
    %3 = arith.mulf %1, %2 : vector<4x32xf32>
    %cst = arith.constant dense<0.000000e+00> : vector<4xf32>
    %4 = vector.multi_reduction <add>, %3, %cst [1] : vector<4x32xf32> to vector<4xf32>
    %5 = vector.shape_cast %4 : vector<4xf32> to vector<4x1xf32>
    %cst_3 = arith.constant 2.000000e+00 : f32
    %6 = vector.broadcast %cst_3 : f32 to vector<4x1xf32>
    %7 = arith.mulf %5, %6 : vector<4x1xf32>
    %8 = arith.truncf %1 : vector<4x32xf32> to vector<4x32xbf16>
    %9 = arith.truncf %2 : vector<4x32xf32> to vector<4x32xbf16>
    %c0_4 = arith.constant 0 : index
    %c0_5 = arith.constant 0 : index
    %10 = vector.load %arg3[%c0_4, %c0_5] : memref<32x4xbf16, #tpu.memory_space<vmem>>, vector<32x4xbf16>
    %c0_6 = arith.constant 0 : index
    %c0_7 = arith.constant 0 : index
    %11 = vector.load %arg4[%c0_6, %c0_7] : memref<32x4xbf16, #tpu.memory_space<vmem>>, vector<32x4xbf16>
    %12 = tpu.iota {dimensions = array<i32: 0>} : vector<4x4xi32>
    %13 = tpu.iota {dimensions = array<i32: 1>} : vector<4x4xi32>
    %14 = vector.broadcast %0 : i32 to vector<4x4xi32>
    %15 = arith.addi %12, %14 : vector<4x4xi32>
    %16 = arith.cmpi eq, %13, %15 : vector<4x4xi32>
    %cst_8 = arith.constant dense<0.000000e+00> : vector<4x4xf32>
    %17 = tpu.matmul %8, %10, %cst_8 {dimension_numbers = #tpu.dot_dimension_numbers<[1], [0], [0], [1], [0, 0, 1, 1], [], []>} : vector<4x32xbf16>, vector<32x4xbf16>, vector<4x4xf32> -> vector<4x4xf32>
    %cst_9 = arith.constant dense<0.000000e+00> : vector<4x4xf32>
    %18 = tpu.matmul %8, %11, %cst_9 {dimension_numbers = #tpu.dot_dimension_numbers<[1], [0], [0], [1], [0, 0, 1, 1], [], []>} : vector<4x32xbf16>, vector<32x4xbf16>, vector<4x4xf32> -> vector<4x4xf32>
    %cst_10 = arith.constant -1.000000e+30 : f32
    %19 = vector.broadcast %cst_10 : f32 to vector<4x4xf32>
    %20 = arith.select %16, %19, %17 : vector<4x4xi1>, vector<4x4xf32>
    %cst_11 = arith.constant dense<0xFF800000> : vector<4xf32>
    %21 = vector.multi_reduction <maximumf>, %20, %cst_11 [1] : vector<4x4xf32> to vector<4xf32>
    %22 = vector.shape_cast %21 : vector<4xf32> to vector<4x1xf32>
    %cst_12 = arith.constant dense<0xFF800000> : vector<4xf32>
    %23 = vector.multi_reduction <maximumf>, %18, %cst_12 [1] : vector<4x4xf32> to vector<4xf32>
    %24 = vector.shape_cast %23 : vector<4xf32> to vector<4x1xf32>
    %25 = arith.maximumf %22, %24 : vector<4x1xf32>
    %26 = vector.broadcast %25 : vector<4x1xf32> to vector<4x4xf32>
    %27 = arith.subf %20, %26 : vector<4x4xf32>
    %28 = math.exp %27 : vector<4x4xf32>
    %cst_13 = arith.constant dense<0.000000e+00> : vector<4xf32>
    %29 = vector.multi_reduction <add>, %28, %cst_13 [1] : vector<4x4xf32> to vector<4xf32>
    %30 = vector.shape_cast %29 : vector<4xf32> to vector<4x1xf32>
    %31 = vector.broadcast %25 : vector<4x1xf32> to vector<4x4xf32>
    %32 = arith.subf %18, %31 : vector<4x4xf32>
    %33 = math.exp %32 : vector<4x4xf32>
    %cst_14 = arith.constant dense<0.000000e+00> : vector<4xf32>
    %34 = vector.multi_reduction <add>, %33, %cst_14 [1] : vector<4x4xf32> to vector<4xf32>
    %35 = vector.shape_cast %34 : vector<4xf32> to vector<4x1xf32>
    %36 = arith.addf %30, %35 : vector<4x1xf32>
    %37 = math.log %36 : vector<4x1xf32>
    %38 = arith.addf %25, %37 : vector<4x1xf32>
    %39 = arith.subf %38, %7 : vector<4x1xf32>
    %cst_15 = arith.constant dense<0.000000e+00> : vector<4x4xf32>
    %40 = tpu.matmul %9, %11, %cst_15 {dimension_numbers = #tpu.dot_dimension_numbers<[1], [0], [0], [1], [0, 0, 1, 1], [], []>} : vector<4x32xbf16>, vector<32x4xbf16>, vector<4x4xf32> -> vector<4x4xf32>
    %cst_16 = arith.constant dense<0.000000e+00> : vector<4x4xf32>
    %41 = tpu.matmul %9, %10, %cst_16 {dimension_numbers = #tpu.dot_dimension_numbers<[1], [0], [0], [1], [0, 0, 1, 1], [], []>} : vector<4x32xbf16>, vector<32x4xbf16>, vector<4x4xf32> -> vector<4x4xf32>
    %cst_17 = arith.constant -1.000000e+30 : f32
    %42 = vector.broadcast %cst_17 : f32 to vector<4x4xf32>
    %43 = arith.select %16, %42, %40 : vector<4x4xi1>, vector<4x4xf32>
    %cst_18 = arith.constant dense<0xFF800000> : vector<4xf32>
    %44 = vector.multi_reduction <maximumf>, %43, %cst_18 [1] : vector<4x4xf32> to vector<4xf32>
    %45 = vector.shape_cast %44 : vector<4xf32> to vector<4x1xf32>
    %cst_19 = arith.constant dense<0xFF800000> : vector<4xf32>
    %46 = vector.multi_reduction <maximumf>, %41, %cst_19 [1] : vector<4x4xf32> to vector<4xf32>
    %47 = vector.shape_cast %46 : vector<4xf32> to vector<4x1xf32>
    %48 = arith.maximumf %45, %47 : vector<4x1xf32>
    %49 = vector.broadcast %48 : vector<4x1xf32> to vector<4x4xf32>
    %50 = arith.subf %43, %49 : vector<4x4xf32>
    %51 = math.exp %50 : vector<4x4xf32>
    %cst_20 = arith.constant dense<0.000000e+00> : vector<4xf32>
    %52 = vector.multi_reduction <add>, %51, %cst_20 [1] : vector<4x4xf32> to vector<4xf32>
    %53 = vector.shape_cast %52 : vector<4xf32> to vector<4x1xf32>
    %54 = vector.broadcast %48 : vector<4x1xf32> to vector<4x4xf32>
    %55 = arith.subf %41, %54 : vector<4x4xf32>
    %56 = math.exp %55 : vector<4x4xf32>
    %cst_21 = arith.constant dense<0.000000e+00> : vector<4xf32>
    %57 = vector.multi_reduction <add>, %56, %cst_21 [1] : vector<4x4xf32> to vector<4xf32>
    %58 = vector.shape_cast %57 : vector<4xf32> to vector<4x1xf32>
    %59 = arith.addf %53, %58 : vector<4x1xf32>
    %60 = math.log %59 : vector<4x1xf32>
    %61 = arith.addf %48, %60 : vector<4x1xf32>
    %62 = arith.subf %61, %7 : vector<4x1xf32>
    %63 = arith.addf %39, %62 : vector<4x1xf32>
    %cst_22 = arith.constant dense<0.000000e+00> : vector<1xf32>
    %64 = vector.multi_reduction <add>, %63, %cst_22 [0] : vector<4x1xf32> to vector<1xf32>
    %65 = vector.shape_cast %64 : vector<1xf32> to vector<1x1xf32>
    %66 = vector.shape_cast %65 : vector<1x1xf32> to vector<1x1xf32>
    %67 = vector.broadcast %66 : vector<1x1xf32> to vector<1x128xf32>
    %c0_23 = arith.constant 0 : index
    %c0_24 = arith.constant 0 : index
    %68 = vector.load %arg5[%c0_23, %c0_24] : memref<1x128xf32, #tpu.memory_space<vmem>>, vector<1x128xf32>
    tpu.vector_store %arg5[%c0_23, %c0_24], %67 {strides = array<i32>} : memref<1x128xf32, #tpu.memory_space<vmem>>, vector<1x128xf32>,
    return
  }
  func.func @transform_0(%arg0: i32) -> (i32, i32) {
    %c0_i32 = arith.constant 0 : i32
    %c0_i32_0 = arith.constant 0 : i32
    return %arg0, %c0_i32 : i32, i32
  }
  func.func @transform_1(%arg0: i32) -> (i32, i32) {
    %c0_i32 = arith.constant 0 : i32
    %c0_i32_0 = arith.constant 0 : i32
    return %arg0, %c0_i32 : i32, i32
  }
  func.func @transform_2(%arg0: i32) -> (i32, i32) {
    %c0_i32 = arith.constant 0 : i32
    %c0_i32_0 = arith.constant 0 : i32
    %c0_i32_1 = arith.constant 0 : i32
    return %c0_i32, %c0_i32_0 : i32, i32
  }
  func.func @transform_3(%arg0: i32) -> (i32, i32) {
    %c0_i32 = arith.constant 0 : i32
    %c0_i32_0 = arith.constant 0 : i32
    %c0_i32_1 = arith.constant 0 : i32
    return %c0_i32, %c0_i32_0 : i32, i32
  }
  func.func @transform_4(%arg0: i32) -> (i32, i32) {
    %c0_i32 = arith.constant 0 : i32
    %c0_i32_0 = arith.constant 0 : i32
    return %c0_i32, %arg0 : i32, i32
  }
}

</mosaic_0001>

<bundles_post_ra>
// kernel: ntxent_loss.1
= control target key start
LH: loop header
LB: loop body
LE: loop exit
PB: predicated region body
PF: predicated region fallthrough
CT: control target
= control target key end

     0   :  { %v370_v0 = vmov 0.0   ;;  %vm371_vm0 = vmmov 0   ;;  %vm56_vm1 = vcmask 261120   ;;  %v37_v9 = vlaneseq  ;;  %s446_s2 = inlined_call_operand.vmem [shape: bf16[32,4], index: 2, kind: input, shape index: {}]   ;;  %s447_s3 = inlined_call_operand.vmem [shape: bf16[32,4], index: 3, kind: input, shape index: {}]   ;;  %s448_s0 = inlined_call_operand.vmem [shape: f32[4,32], index: 0, kind: input, shape index: {}]   ;;  %s449_s1 = inlined_call_operand.vmem [shape: f32[4,32], index: 1, kind: input, shape index: {}]   ;;  %s450_s4 = inlined_call_operand.vmem [shape: f32[1,128], index: 4, kind: output, shape index: {}]  }
   0x1   :  { %320 = vmatprep.subr.bf16.mxu0 %v370_v0  ;;  %v354_v1 = vld [vmem:[%s446_s2] sm:$0xff]   ;;  %328 = vmatprep.subr.bf16.mxu1 %v370_v0  ;;  %v356_v3 = vld [vmem:[%s446_s2 + $0x8] sm:$0xff]   ;;  %vm153_vm3 = vcmask 27648   ;;  %vm22_vm4 = vcmask 257024   ;;  %vm287_vm5 = vcmask 1043456  }
   0x2   :  { %v355_v2 = vld [vmem:[%s447_s3] sm:$0xff]   ;;  %324 = vmatprep.mubr.msk.bf16.mxu0 %vm371_vm0, %v370_v0  ;;  %332 = vmatprep.mubr.msk.bf16.mxu1 %vm371_vm0, %v370_v0  ;;  %v357_v5 = vld [vmem:[%s447_s3 + $0x8] sm:$0xff]   ;;  %v38_v10 = vshrl.u32 %v37_v9, 7  ;;  %v40_v11 = vand.u32 127, %v37_v9 }
   0x3   :  { %321 = vmatpush3.bf16.msra.mxu0 %v354_v1  ;;  %329 = vmatpush3.bf16.msra.mxu1 %v355_v2  ;;  %v411_v4 = vld [vmem:[%s448_s0] sm:$0xf] }
   0x4   :  { %322 = vmatprep.subr.bf16.mxu0 %v370_v0  ;;  %330 = vmatprep.subr.bf16.mxu1 %v370_v0  ;;  %v27_v6 = vpack.c.bf16 %v411_v4, %v411_v4  ;;  %v423_v7 = vld [vmem:[%s449_s1] sm:$0xf]  ;;  %vm43_vm2 = vcmp.eq.s32.totalorder %v40_v11, %v38_v10 }
   0x5   :  { %v28_v8 = vpack.c.bf16 %v423_v7, %v423_v7  ;;  %v21_v52 = vmul.f32 %v423_v7, %v411_v4 }
   0x7   :  { %323 = vmatpush3.bf16.msra.mxu0 %v356_v3  ;;  %331 = vmatpush3.bf16.msra.mxu1 %v357_v5  ;;  %v23_v57 = vsel %vm22_vm4, %v21_v52, 0.0 }
   0x8   :  { %336 = vmatprep.subr.bf16.mxu0 %v370_v0  ;;  %344 = vmatprep.subr.bf16.mxu1 %v370_v0 }
   0xa   :  { %325 = vmatmul.mubr.msk.bf16.vlgmr.msra.gmra.mrb[0].mxu0 %vm56_vm1, %v27_v6  ;;  %333 = vmatmul.mubr.msk.bf16.vlgmr.msra.gmra.mrb[0].mxu1 %vm56_vm1, %v27_v6 }
   0xb   :  { %337 = vmatpush3.bf16.msra.mxu0 %v355_v2  ;;  %345 = vmatpush3.bf16.msra.mxu1 %v354_v1 }
   0xc   :  { %338 = vmatprep.subr.bf16.mxu0 %v370_v0  ;;  %340 = vmatprep.mubr.msk.bf16.mxu0 %vm371_vm0, %v370_v0 }
   0xd   :  { %346 = vmatprep.subr.bf16.mxu1 %v370_v0  ;;  %348 = vmatprep.mubr.msk.bf16.mxu1 %vm371_vm0, %v370_v0 }
   0xf   :  { %339 = vmatpush3.bf16.msra.mxu0 %v357_v5  ;;  %347 = vmatpush3.bf16.msra.mxu1 %v356_v3 }
  0x12   :  { %341 = vmatmul.mubr.msk.bf16.vlgmr.msra.gmra.mrb[4].mxu0 %vm56_vm1, %v28_v8  ;;  %349 = vmatmul.mubr.msk.bf16.vlgmr.msra.gmra.mrb[4].mxu1 %vm56_vm1, %v28_v8 }
  0xdd   :  { %v94_v12 = vpop.f32.mrb[0].mxu0  ;;  %v146_v15 = vpop.f32.mrb[0].mxu1 }
  0xde   :  { %v152_v13 = vsel %vm43_vm2, -1e+30, %v94_v12  ;;  %v326_v14 = vpop.f32.mrb[1].mxu0  ;;  %v334_v18 = vpop.f32.mrb[1].mxu1  ;;  %v157_v22 = vsel %vm153_vm3, %v146_v15, -inf }
  0xdf   :  { %v97_v16 = vpop.f32.mrb[2].mxu0  ;;  %v154_v17 = vsel %vm153_vm3, %v152_v13, -inf  ;;  %v149_v20 = vpop.f32.mrb[2].mxu1 }
  0xe0   :  { %155 = vmax.xlane.f32.xlu0 %v154_v17  ;;  %v327_v19 = vpop.f32.mrb[3].mxu0  ;;  %v335_v21 = vpop.f32.mrb[3].mxu1 }
  0xe4   :  { %158 = vmax.xlane.f32.xlu0 %v157_v22 }
  0xe5   :  { %v215_v23 = vpop.f32.mrb[4].mxu0  ;;  %v255_v26 = vpop.f32.mrb[4].mxu1 }
  0xe6   :  { %v261_v24 = vsel %vm43_vm2, -1e+30, %v215_v23  ;;  %v342_v25 = vpop.f32.mrb[5].mxu0  ;;  %v350_v29 = vpop.f32.mrb[5].mxu1  ;;  %v265_v33 = vsel %vm153_vm3, %v255_v26, -inf }
  0xe7   :  { %v218_v27 = vpop.f32.mrb[6].mxu0  ;;  %v262_v28 = vsel %vm153_vm3, %v261_v24, -inf  ;;  %v258_v31 = vpop.f32.mrb[6].mxu1 }
  0xe8   :  { %263 = vmax.xlane.f32.xlu1 %v262_v28  ;;  %v343_v30 = vpop.f32.mrb[7].mxu0  ;;  %v351_v32 = vpop.f32.mrb[7].mxu1 }
  0xec   :  { %266 = vmax.xlane.f32.xlu1 %v265_v33 }
 0x16d   :  { %v156_v34 = vpop.xlane.xlu0 %155 }
 0x171   :  { %v159_v35 = vpop.xlane.xlu0 %158 }
 0x172   :  { %v160_v36 = vmax.f32 %v156_v34, %v159_v35 }
 0x174   :  { %v161_v37 = vsub.f32 %v152_v13, %v160_v36  ;;  %v167_v38 = vsub.f32 %v146_v15, %v160_v36 }
 0x175   :  { %v264_v39 = vpop.xlane.xlu1 %263 }
 0x176   :  { %v162_v40 = vmul.f32 1.442695, %v161_v37  ;;  %v168_v41 = vmul.f32 1.442695, %v167_v38 }
 0x178   :  { %358 = vpow2.f32 %v162_v40 }
 0x179   :  { %360 = vpow2.f32 %v168_v41  ;;  %v267_v42 = vpop.xlane.xlu1 %266 }
 0x17a   :  { %v268_v43 = vmax.f32 %v264_v39, %v267_v42 }
 0x17c   :  { %v269_v44 = vsub.f32 %v261_v24, %v268_v43  ;;  %v275_v45 = vsub.f32 %v255_v26, %v268_v43 }
 0x17e   :  { %v270_v46 = vmul.f32 1.442695, %v269_v44  ;;  %v276_v47 = vmul.f32 1.442695, %v275_v45 }
 0x180   :  { %362 = vpow2.f32 %v270_v46 }
 0x181   :  { %364 = vpow2.f32 %v276_v47 }
 0x182   :  { %v359_v48 = vpop.eup %358 }
 0x183   :  { %v361_v49 = vpop.eup %360  ;;  %v164_v50 = vsel %vm153_vm3, %v359_v48, 0.0 }
 0x184   :  { %165 = vadd.xlane.f32.xlu0 %v164_v50  ;;  %v170_v51 = vsel %vm153_vm3, %v361_v49, 0.0 }
 0x185   :  { %171 = vadd.xlane.f32.xlu1 %v170_v51 }
 0x18a   :  { %v363_v53 = vpop.eup %362 }
 0x18b   :  { %v365_v54 = vpop.eup %364  ;;  %v272_v55 = vsel %vm153_vm3, %v363_v53, 0.0 }
 0x18c   :  { %v278_v56 = vsel %vm153_vm3, %v365_v54, 0.0  ;;  %273 = vadd.xlane.f32.xlu0 %v272_v55 }
 0x18d   :  { %279 = vadd.xlane.f32.xlu1 %v278_v56 }
 0x190   :  { %24 = vadd.xlane.f32.xlu0 %v23_v57 }
 0x211   :  { %v166_v58 = vpop.xlane.xlu0 %165 }
 0x212   :  { %v172_v59 = vpop.xlane.xlu1 %171 }
 0x213   :  { %v173_v60 = vadd.f32 %v172_v59, %v166_v58 }
 0x215   :  { %366 = vlog2.f32 %v173_v60 }
 0x219   :  { %v274_v61 = vpop.xlane.xlu0 %273 }
 0x21a   :  { %v280_v62 = vpop.xlane.xlu1 %279 }
 0x21b   :  { %v281_v63 = vadd.f32 %v280_v62, %v274_v61 }
 0x21d   :  { %368 = vlog2.f32 %v281_v63  ;;  %v25_v2 = vpop.xlane.xlu0 %24 }
 0x21e   :  { %v26_v6 = vmul.f32 2.0, %v25_v2 }
 0x21f   :  { %v367_v0 = vpop.eup %366 }
 0x220   :  { %v175_v1 = vmul.f32 0.6931472, %v367_v0 }
 0x222   :  { %v176_v5 = vadd.f32 %v175_v1, %v160_v36 }
 0x224   :  { %v177_v8 = vsub.f32 %v176_v5, %v26_v6 }
 0x227   :  { %v369_v3 = vpop.eup %368 }
 0x228   :  { %v283_v4 = vmul.f32 0.6931472, %v369_v3 }
 0x22a   :  { %v284_v7 = vadd.f32 %v283_v4, %v268_v43 }
 0x22c   :  { %v285_v9 = vsub.f32 %v284_v7, %v26_v6 }
 0x22e   :  { %v286_v10 = vadd.f32 %v285_v9, %v177_v8 }
 0x230   :  { %v288_v11 = vsel %vm287_vm5, %v286_v10, 0.0 }
 0x231   :  { %v289_v12 = vrot.slane %v288_v11, 4 }
 0x233   :  { %v290_v13 = vadd.f32 %v289_v12, %v288_v11 }
 0x235   :  { %v291_v14 = vrot.slane %v290_v13, 2 }
 0x237   :  { %v292_v15 = vadd.f32 %v291_v14, %v290_v13 }
 0x239   :  { %v293_v16 = vrot.slane %v292_v15, 1 }
 0x23b   :  { %v294_v17 = vadd.f32 %v293_v16, %v292_v15 }
 0x23d   :  { %295 = vst [vmem:[%s450_s4] sm:$0x1] %v294_v17 }

</bundles_post_ra>
